<compile_context>
chip_gen: v7x
topology: tpu7x:2x2x1
jax: 0.10.0
libtpu: 0.0.40
codegen_flags: <defaults>
</compile_context>

<pallas_src>
import jax
import jax.numpy as jnp
from jax.experimental import pallas as pl
from jax.experimental.pallas import tpu as pltpu


def _round_up(x, m):
    return (x + m - 1) // m * m


def _make_mean_pool_kernel(n_nodes, node_tile, needs_row_mask):
    """Build the kernel with static node count / tile size baked in."""

    def kernel(batch_ref, x_ref, o_ref, acc_ref, cnt_ref):
        # batch_ref: (1, tn)   int32, -1 marks padded nodes
        # x_ref    : (tn, fb)  source dtype; boundary tile may contain garbage rows
        # o_ref    : (Gp, fb)  output block (x dtype), written once at finalize
        # acc_ref  : (Gp, fb)  f32 resident accumulator (VMEM scratch)
        # cnt_ref  : (Gp, 1)   f32 per-graph node counts (VMEM scratch)
        step = pl.program_id(1)

        @pl.when(step == 0)
        def _init():
            acc_ref[...] = jnp.zeros_like(acc_ref)
            cnt_ref[...] = jnp.zeros_like(cnt_ref)

        x_tile = x_ref[...]
        if needs_row_mask:
            # Zero out-of-bounds rows of the boundary tile so garbage/NaN cannot
            # leak through the matmul (0 * NaN = NaN otherwise).
            row_ids = (
                jax.lax.broadcasted_iota(jnp.int32, x_tile.shape, 0)
                + step * node_tile
            )
            x_tile = jnp.where(row_ids < n_nodes, x_tile, jnp.zeros_like(x_tile))

        b_ids = batch_ref[...]                                         # (1, tn)
        g_iota = jax.lax.broadcasted_iota(
            jnp.int32, (acc_ref.shape[0], b_ids.shape[1]), 0)          # (Gp, tn)
        onehot = g_iota == b_ids                                       # pad -> all False

        # Segment-sum on the MXU with f32 accumulation.
        acc_ref[...] += jnp.dot(
            onehot.astype(x_tile.dtype), x_tile,
            preferred_element_type=jnp.float32)
        cnt_ref[...] += jnp.sum(
            onehot.astype(jnp.float32), axis=1, keepdims=True)

        @pl.when(step == pl.num_programs(1) - 1)
        def _finalize():
            cnt = cnt_ref[...]
            inv = jnp.where(cnt > 0.0, 1.0 / cnt, 0.0)   # empty graph -> 0 (PyG)
            o_ref[...] = (acc_ref[...] * inv).astype(o_ref.dtype)

    return kernel


def global_mean_pool(x, batch, num_graphs):
    """Pallas equivalent of torch_geometric.nn.global_mean_pool(x, batch)."""
    n, f = x.shape
    itemsize = jnp.dtype(x.dtype).itemsize
    g_pad = _round_up(max(int(num_graphs), 1), 8)

    # Feature blocking: leading "parallel" grid axis (keeps both TensorCores
    # busy on 2-TC chips) when F is large and 128-aligned; otherwise a single
    # full-width block (legal: block dim == full array dim).
    fb = f
    if f >= 256 and f % 128 == 0:
        for cand in (512, 384, 256, 128):
            if f % cand == 0:
                fb = cand
                break
    n_fblocks = f // fb

    # Node tiling: biggest tile whose (up to 3) pipelined x buffers fit a
    # ~24 MiB budget; multiple of 128 so the batch-id block stays legal.
    buf_budget = 24 * 1024 * 1024
    tn_cap = buf_budget // (3 * fb * itemsize)
    tn_cap = max(128, min(2048, (tn_cap // 128) * 128))
    if n <= tn_cap:
        tn = _round_up(max(n, 1), 8)
        grid_nodes = 1
    else:
        tn = tn_cap
        grid_nodes = -(-n // tn)
    n_pad = grid_nodes * tn
    needs_row_mask = n_pad != n

    # Only the tiny batch-id vector is padded on the host (-1 = "no graph");
    # x goes to the kernel unpadded and in its source dtype.
    batch_p = (
        jnp.full((1, n_pad), -1, dtype=jnp.int32)
        .at[0, :n].set(batch.astype(jnp.int32))
    )

    x_spec_kwargs = {}
    if grid_nodes >= 3:
        x_spec_kwargs["pipeline_mode"] = pl.Buffered(3)   # hide DMA latency

    cost = pl.CostEstimate(
        flops=2 * n_pad * g_pad * f,
        transcendentals=0,
        bytes_accessed=n * f * itemsize + 4 * n_pad * n_fblocks
        + g_pad * f * itemsize,
    )

    kernel = _make_mean_pool_kernel(n, tn, needs_row_mask)

    out = pl.pallas_call(
        kernel,
        out_shape=jax.ShapeDtypeStruct((g_pad, f), x.dtype),
        grid_spec=pltpu.PrefetchScalarGridSpec(
            num_scalar_prefetch=0,
            grid=(n_fblocks, grid_nodes),
            in_specs=[
                pl.BlockSpec((1, tn), lambda jf, s: (0, s)),             # batch ids
                pl.BlockSpec((tn, fb), lambda jf, s: (s, jf),
                             **x_spec_kwargs),                           # x tile
            ],
            out_specs=pl.BlockSpec((g_pad, fb), lambda jf, s: (0, jf)),  # resident
            scratch_shapes=[
                pltpu.VMEM((g_pad, fb), jnp.float32),   # f32 accumulator
                pltpu.VMEM((g_pad, 1), jnp.float32),    # per-graph counts
            ],
        ),
        compiler_params=pltpu.CompilerParams(
            dimension_semantics=("parallel", "arbitrary"),  # features || , nodes = reduce
            vmem_limit_bytes=48 * 1024 * 1024,
        ),
        cost_estimate=cost,
    )(batch_p, x)

    return out[:num_graphs, :]


if __name__ == "__main__":
    key = jax.random.PRNGKey(0)
    num_nodes, num_features, num_graphs = 16, 32, 3

    x = jax.random.normal(key, (num_nodes, num_features), jnp.float32)
    # 16 nodes split into 3 graphs of sizes 5, 6, 5 (PyG-style `batch` vector).
    batch = jnp.concatenate(
        [
            jnp.full((5,), 0, jnp.int32),
            jnp.full((6,), 1, jnp.int32),
            jnp.full((5,), 2, jnp.int32),
        ]
    )

    out = global_mean_pool(x, batch, num_graphs)
    out = jax.block_until_ready(out)
    assert out.shape == (num_graphs, num_features)

    # Plain-JAX reference (segment mean) for a sanity check.
    one_hot = (batch[None, :] == jnp.arange(num_graphs)[:, None]).astype(jnp.float32)
    ref = (one_hot @ x) / one_hot.sum(axis=1, keepdims=True)
    assert jnp.allclose(out, ref, atol=1e-5, rtol=1e-5)

    print("KERNEL_OK")
</pallas_src>

<mosaic_0001>
module attributes {stable_mosaic.version = 11 : i64} {
  func.func @kernel(%arg0: i32, %arg1: i32, %arg2: memref<1x16xi32, #tpu.memory_space<vmem>>, %arg3: memref<16x32xf32, #tpu.memory_space<vmem>>, %arg4: memref<8x32xf32, #tpu.memory_space<vmem>>, %arg5: memref<8x32xf32, #tpu.memory_space<vmem>>, %arg6: memref<8x1xf32, #tpu.memory_space<vmem>>) attributes {dimension_semantics = [#tpu.dimension_semantics<parallel>, #tpu.dimension_semantics<arbitrary>], iteration_bounds = array<i64: 1, 1>, scalar_prefetch = 0 : i64, scratch_operands = 2 : i64, tpu.core_type = #tpu.core_type<tc>, window_params = [{transform_indices = @transform_0, window_bounds = array<i64: 1, 16>}, {transform_indices = @transform_1, window_bounds = array<i64: 16, 32>}, {transform_indices = @transform_2, window_bounds = array<i64: 8, 32>}]} {
    %c0_i32 = arith.constant 0 : i32
    %0 = arith.cmpi eq, %arg1, %c0_i32 : i32
    %1 = arith.extui %0 : i1 to i32
    %c0_i32_0 = arith.constant 0 : i32
    %2 = arith.cmpi ne, %1, %c0_i32_0 : i32
    scf.if %2 {
      %cst_15 = arith.constant 0.000000e+00 : f32
      %24 = vector.broadcast %cst_15 : f32 to vector<8x32xf32>
      %c0_16 = arith.constant 0 : index
      %c0_17 = arith.constant 0 : index
      %25 = vector.load %arg5[%c0_16, %c0_17] : memref<8x32xf32, #tpu.memory_space<vmem>>, vector<8x32xf32>
      tpu.vector_store %arg5[%c0_16, %c0_17], %24 {strides = array<i32>} : memref<8x32xf32, #tpu.memory_space<vmem>>, vector<8x32xf32>,
      %cst_18 = arith.constant 0.000000e+00 : f32
      %26 = vector.broadcast %cst_18 : f32 to vector<8x1xf32>
      %c0_19 = arith.constant 0 : index
      %c0_20 = arith.constant 0 : index
      %27 = vector.load %arg6[%c0_19, %c0_20] : memref<8x1xf32, #tpu.memory_space<vmem>>, vector<8x1xf32>
      tpu.vector_store %arg6[%c0_19, %c0_20], %26 {strides = array<i32>} : memref<8x1xf32, #tpu.memory_space<vmem>>, vector<8x1xf32>,
    } else {
    }
    %c0 = arith.constant 0 : index
    %c0_1 = arith.constant 0 : index
    %3 = vector.load %arg3[%c0, %c0_1] : memref<16x32xf32, #tpu.memory_space<vmem>>, vector<16x32xf32>
    %c0_2 = arith.constant 0 : index
    %c0_3 = arith.constant 0 : index
    %4 = vector.load %arg2[%c0_2, %c0_3] : memref<1x16xi32, #tpu.memory_space<vmem>>, vector<1x16xi32>
    %5 = tpu.iota {dimensions = array<i32: 0>} : vector<8x16xi32>
    %6 = vector.broadcast %4 : vector<1x16xi32> to vector<8x16xi32>
    %7 = arith.cmpi eq, %5, %6 : vector<8x16xi32>
    %c0_4 = arith.constant 0 : index
    %c0_5 = arith.constant 0 : index
    %8 = vector.load %arg5[%c0_4, %c0_5] : memref<8x32xf32, #tpu.memory_space<vmem>>, vector<8x32xf32>
    %9 = arith.extui %7 : vector<8x16xi1> to vector<8x16xi32>
    %10 = arith.sitofp %9 : vector<8x16xi32> to vector<8x16xf32>
    %cst = arith.constant dense<0.000000e+00> : vector<8x32xf32>
    %11 = tpu.matmul %10, %3, %cst {dimension_numbers = #tpu.dot_dimension_numbers<[1], [0], [0], [1], [0, 0, 1, 1], [], []>} : vector<8x16xf32>, vector<16x32xf32>, vector<8x32xf32> -> vector<8x32xf32>
    %12 = arith.addf %8, %11 : vector<8x32xf32>
    %c0_6 = arith.constant 0 : index
    %c0_7 = arith.constant 0 : index
    %13 = vector.load %arg5[%c0_6, %c0_7] : memref<8x32xf32, #tpu.memory_space<vmem>>, vector<8x32xf32>
    tpu.vector_store %arg5[%c0_6, %c0_7], %12 {strides = array<i32>} : memref<8x32xf32, #tpu.memory_space<vmem>>, vector<8x32xf32>,
    %c0_8 = arith.constant 0 : index
    %c0_9 = arith.constant 0 : index
    %14 = vector.load %arg6[%c0_8, %c0_9] : memref<8x1xf32, #tpu.memory_space<vmem>>, vector<8x1xf32>
    %15 = arith.extui %7 : vector<8x16xi1> to vector<8x16xi32>
    %16 = arith.sitofp %15 : vector<8x16xi32> to vector<8x16xf32>
    %cst_10 = arith.constant dense<0.000000e+00> : vector<8xf32>
    %17 = vector.multi_reduction <add>, %16, %cst_10 [1] : vector<8x16xf32> to vector<8xf32>
    %18 = vector.shape_cast %17 : vector<8xf32> to vector<8x1xf32>
    %19 = arith.addf %14, %18 : vector<8x1xf32>
    %c0_11 = arith.constant 0 : index
    %c0_12 = arith.constant 0 : index
    %20 = vector.load %arg6[%c0_11, %c0_12] : memref<8x1xf32, #tpu.memory_space<vmem>>, vector<8x1xf32>
    tpu.vector_store %arg6[%c0_11, %c0_12], %19 {strides = array<i32>} : memref<8x1xf32, #tpu.memory_space<vmem>>, vector<8x1xf32>,
    %c0_i32_13 = arith.constant 0 : i32
    %21 = arith.cmpi eq, %arg1, %c0_i32_13 : i32
    %22 = arith.extui %21 : i1 to i32
    %c0_i32_14 = arith.constant 0 : i32
    %23 = arith.cmpi ne, %22, %c0_i32_14 : i32
    scf.if %23 {
      %c0_15 = arith.constant 0 : index
      %c0_16 = arith.constant 0 : index
      %24 = vector.load %arg6[%c0_15, %c0_16] : memref<8x1xf32, #tpu.memory_space<vmem>>, vector<8x1xf32>
      %cst_17 = arith.constant 0.000000e+00 : f32
      %25 = vector.broadcast %cst_17 : f32 to vector<8x1xf32>
      %26 = arith.cmpf ogt, %24, %25 : vector<8x1xf32>
      %cst_18 = arith.constant 1.000000e+00 : f32
      %27 = vector.broadcast %cst_18 : f32 to vector<8x1xf32>
      %28 = arith.divf %27, %24 : vector<8x1xf32>
      %cst_19 = arith.constant 0.000000e+00 : f32
      %29 = vector.broadcast %cst_19 : f32 to vector<8x1xf32>
      %30 = arith.select %26, %28, %29 : vector<8x1xi1>, vector<8x1xf32>
      %c0_20 = arith.constant 0 : index
      %c0_21 = arith.constant 0 : index
      %31 = vector.load %arg5[%c0_20, %c0_21] : memref<8x32xf32, #tpu.memory_space<vmem>>, vector<8x32xf32>
      %32 = vector.broadcast %30 : vector<8x1xf32> to vector<8x32xf32>
      %33 = arith.mulf %31, %32 : vector<8x32xf32>
      %c0_22 = arith.constant 0 : index
      %c0_23 = arith.constant 0 : index
      %34 = vector.load %arg4[%c0_22, %c0_23] : memref<8x32xf32, #tpu.memory_space<vmem>>, vector<8x32xf32>
      tpu.vector_store %arg4[%c0_22, %c0_23], %33 {strides = array<i32>} : memref<8x32xf32, #tpu.memory_space<vmem>>, vector<8x32xf32>,
    } else {
    }
    return
  }
  func.func @transform_0(%arg0: i32, %arg1: i32) -> (i32, i32) {
    %c0_i32 = arith.constant 0 : i32
    %c0_i32_0 = arith.constant 0 : i32
    return %c0_i32, %arg1 : i32, i32
  }
  func.func @transform_1(%arg0: i32, %arg1: i32) -> (i32, i32) {
    %c0_i32 = arith.constant 0 : i32
    return %arg1, %arg0 : i32, i32
  }
  func.func @transform_2(%arg0: i32, %arg1: i32) -> (i32, i32) {
    %c0_i32 = arith.constant 0 : i32
    %c0_i32_0 = arith.constant 0 : i32
    return %c0_i32, %arg0 : i32, i32
  }
}

</mosaic_0001>

<bundles_post_ra>
// kernel: tpu_custom_call.1
= control target key start
LH: loop header
LB: loop body
LE: loop exit
PB: predicated region body
PF: predicated region fallthrough
CT: control target
= control target key end

     0   :  { %7 = vsyncpa [#allocation5], 0  ;;  %s347_s0 = inlined_call_operand.hbm [shape: s32[1,16], index: 0, kind: input, shape index: {}]   ;;  %s348_s1 = inlined_call_operand.hbm [shape: f32[16,32], index: 1, kind: input, shape index: {}]   ;;  %s349_s2 = inlined_call_operand.hbm [shape: f32[8,32], index: 2, kind: output, shape index: {}]  }
   0x1   :  { %8 = vsyncpa [#allocation8], 0 }
   0x2   :  { %9 = vsyncpa [#allocation6], 0  ;;  %s275_s9 = smov [#allocation4]   ;;  %s276_s11 = smov [#allocation7]  }
   0x3   :  { %s16_s10 = sshll.u32 %s275_s9, 4  ;;  %s25_s12 = sshll.u32 %s276_s11, 4  ;;  %s17_s10 = int_to_ptr.vmem [resolvable:$true] %s16_s10  ;;  %s299_s12 = int_to_ptr.vmem [resolvable:$true] %s25_s12 }
   0x4   :  { %s203_s15 = scalar_lea.hbm %s347_s0, 16 }
   0x5   :  { %p204_p0 = scmp.ne.s32.totalorder %s347_s0, %s203_s15  ;;  %p207_p1 = scmp.lt.u32.totalorder %s203_s15, %s347_s0 }
   0x7   :  { %p209_p2 = pnand %p207_p1, %p204_p0 }
   0x9   :  { %212 = shalt.err (!%p209_p2)
}
   0xa   :  { %s213_s20 = scalar_lea.vmem %s17_s10, 16  ;;  %s217_s21 = scalar_lea.vmem %s17_s10, 32 }
   0xb   :  { %p214_p3 = scmp.ne.s32.totalorder %s17_s10, %s213_s20  ;;  %p218_p4 = scmp.lt.s32.totalorder %s17_s10, %s17_s10 }
   0xc   :  { %p219_p5 = scmp.lt.s32.totalorder %s217_s21, %s213_s20 }
   0xe   :  { %p220_p6 = por %p219_p5, %p218_p4 }
  0x10   :  { %p221_p7 = pnand %p220_p6, %p214_p3 }
  0x12   :  { %224 = shalt.err (!%p221_p7)
}
  0x13   :  { %19 = dma.hbm_to_vmem [thread:$0]  %s347_s0, 16, %s17_s10, [#allocation5]  }
  0x14   :  { %s225_s26 = scalar_lea.hbm %s348_s1, 256 }
  0x15   :  { %p226_p8 = scmp.ne.s32.totalorder %s348_s1, %s225_s26  ;;  %p229_p9 = scmp.lt.u32.totalorder %s225_s26, %s348_s1 }
  0x17   :  { %p231_p10 = pnand %p229_p9, %p226_p8 }
  0x19   :  { %234 = shalt.err (!%p231_p10)
}
  0x1a   :  { %s235_s3 = scalar_lea.vmem %s299_s12, 256  ;;  %p240_p12 = scmp.lt.s32.totalorder %s299_s12, %s299_s12 }
  0x1b   :  { %p236_p11 = scmp.ne.s32.totalorder %s299_s12, %s235_s3  ;;  %p241_p13 = scmp.lt.s32.totalorder %s235_s3, %s235_s3 }
  0x1d   :  { %p242_p0 = por %p241_p13, %p240_p12 }
  0x1f   :  { %p243_p1 = pnand %p242_p0, %p236_p11 }
  0x21   :  { %246 = shalt.err (!%p243_p1)
}
  0x22   :  { %s277_s0 = smov 128   ;;  %s278_s4 = smov 8  }
  0x23   :  { %31 = dma.hbm_to_vmem [thread:$0]  %s348_s1, 256, %s299_s12, [#allocation8], %s277_s0, %s277_s0, %s278_s4  }
  0x24   :  { %269 = dma.done.wait [#allocation5], 16  }
  0x25   :  { %270 = vsyncadd [#allocation5], 4294967280 }
  0x26   :  { %271 = dma.done.wait [#allocation8], 256  }
  0x27   :  { %272 = vsyncadd [#allocation8], 4294967040  ;;  %vm44_vm0 = vcmask 7168   ;;  %v49_v0 = vlaneseq  ;;  %v279_v1 = vmov 0.0   ;;  %v280_v2 = vmov 0.0|0.0   ;;  %v46_v5 = vld [vmem:[#allocation7] sm:$0xff] }
  0x28   :  { %45 = vst.msk [vmem:[#allocation3] sm:$0xff] %vm44_vm0, %v279_v1  ;;  %188 = vmatprep.subr.bf16.mxu0 %v280_v2  ;;  %vm281_vm1 = vmmov 0   ;;  %v175_v4 = vld [vmem:[#allocation4] ss:$0 sm:$0xff]  ;;  %vm59_vm2 = vcmask 130048   ;;  %v47_v6 = vld [vmem:[#allocation7 + $0x8] sm:$0xff] }
  0x29   :  { %185 = vmatprep.mubr.msk.f32.mxu0 %vm281_vm1, %v279_v1  ;;  %v50_v3 = vshrl.u32 %v49_v0, 7  ;;  %v189_v7 = vpack.c.bf16 %v47_v6, %v46_v5  ;;  %v282_v10 = vmov 0   ;;  %vm42_vm4 = vcmask 261120   ;;  %s283_s1 = smov [#allocation9]  }
  0x2a   :  { %200 = vset.pattern.permute.xlu0 %v282_v10  ;;  %43 = vst.msk [vmem:[#allocation2] sm:$0xff] %vm42_vm4, %v279_v1  ;;  %s165_s7 = sshll.u32 %s283_s1, 4  ;;  %s166_s7 = int_to_ptr.vmem [resolvable:$true] %s165_s7 }
  0x2b   :  { %vm55_vm3 = vcmp.eq.s32.totalorder %v50_v3, %v175_v4  ;;  %190 = vmatpush3.bf16.msra.mxu0 %v189_v7  ;;  %s247_s8 = scalar_lea.vmem %s166_s7, 128  ;;  %p252_p3 = scmp.lt.s32.totalorder %s166_s7, %s166_s7 }
  0x2c   :  { %v176_v8 = vsel %vm55_vm3, 1.0, %v279_v1  ;;  %p248_p2 = scmp.ne.s32.totalorder %s166_s7, %s247_s8  ;;  %p253_p4 = scmp.lt.s32.totalorder %s247_s8, %s247_s8 }
  0x2d   :  { %v137_v9 = vsel %vm59_vm2, %v176_v8, 0.0 }
  0x2e   :  { %138 = vadd.xlane.f32.xlu0 %v137_v9  ;;  %186 = vmatmul.mubr.msk.f32.vlgmr.msra.gmra.mrb[0].mxu0 %vm59_vm2, %v176_v8  ;;  %p254_p5 = por %p253_p4, %p252_p3 }
  0x2f   :  { %v136_v11 = vld [vmem:[#allocation3] sm:$0xff] }
  0x30   :  { %p255_p6 = pnand %p254_p5, %p248_p2 }
  0x31   :  { %v56_v17 = vld [vmem:[#allocation2] sm:$0xff] }
  0xbb   :  { %v139_v12 = vpop.xlane.xlu0 %138 }
  0xbc   :  { %v140_v13 = vadd.f32 %v139_v12, %v136_v11 }
  0xbe   :  { %142 = vst.msk [vmem:[#allocation3] sm:$0xff] %vm44_vm0, %v140_v13 }
  0xc5   :  { %v146_v14 = vld [vmem:[#allocation3] sm:$0xff] }
  0xc6   :  { %201 = vrcp.f32 %v146_v14  ;;  %vm147_vm5 = vcmp.gt.f32.partialorder %v146_v14, 0.0 }
  0xd0   :  { %v202_v15 = vpop.eup %201 }
  0xd1   :  { %v150_v16 = vsel %vm147_vm5, %v202_v15, 0.0 }
  0xd2   :  { %154 = vperm.xlu0 %200, %v150_v16  }
 0x101   :  { %v129_v18 = vpop.f32.mrb[0].mxu0 }
 0x102   :  { %v133_v19 = vadd.f32 %v129_v18, %v56_v17  ;;  %v187_v20 = vpop.f32.mrb[1].mxu0 }
 0x104   :  { %135 = vst.msk [vmem:[#allocation2] sm:$0xff] %vm42_vm4, %v133_v19 }
 0x10b   :  { %v151_v21 = vld [vmem:[#allocation2] sm:$0xff] }
 0x151   :  { %v155_v22 = vpop.permute.xlu0 %154 }
 0x152   :  { %v157_v23 = vmul.f32 %v155_v22, %v151_v21 }
 0x154   :  { %158 = vst.msk [vmem:[#allocation9] sm:$0xff] %vm42_vm4, %v157_v23 }
 0x155   :  { %258 = shalt.err (!%p255_p6)
}
 0x156   :  { %s259_s11 = scalar_lea.hbm %s349_s2, 128 }
 0x157   :  { %p260_p7 = scmp.ne.s32.totalorder %s349_s2, %s259_s11  ;;  %p263_p8 = scmp.lt.u32.totalorder %s259_s11, %s349_s2 }
 0x159   :  { %p265_p9 = pnand %p263_p8, %p260_p7 }
 0x15b   :  { %268 = shalt.err (!%p265_p9)
}
 0x15c   :  { %168 = dma.vmem_to_hbm [thread:$0]  %s166_s7, 128, %s349_s2, [#allocation6]  }
 0x15d   :  { %273 = dma.done.wait [#allocation6], 128  }
 0x15e   :  { %274 = vsyncadd [#allocation6], 4294967168 }
 0x15f   :  { %172 = vsyncpa [#allocation5], 1 }
 0x160   :  { %173 = vsyncpa [#allocation8], 1 }
 0x161   :  { %174 = vsyncpa [#allocation6], 1 }

</bundles_post_ra>
